<compile_context>
chip_gen: v7x
topology: tpu7x:2x2x1
jax: 0.10.0
libtpu: 0.0.40
codegen_flags: <defaults>
</compile_context>

<pallas_src>
import functools

import jax
import jax.numpy as jnp
from jax.experimental import pallas as pl
from jax.experimental.pallas import tpu as pltpu

BN_EPS = 0.001

# ~12 MiB of f32 activation tiles per grid step (before double-buffering):
# 2x buffering of in+out tiles plus weights stays well under v7x's 64 MiB VMEM.
_TILE_BUDGET_BYTES = 12 << 20
# Raise the scoped VMEM limit above the 16 MiB (v5e) / 32 MiB (v6e/v7x) defaults
# while keeping headroom on v7x's 64 MiB physical VMEM.
_VMEM_LIMIT_BYTES = 48 << 20


# ----------------------------------------------------------------------------
# Kernel helpers (shared by both kernel variants).
# ----------------------------------------------------------------------------
def _conv_bn_prelu(fsp, fcp, w0a, w0b, bias, alpha):
    """Folded 1x1 conv + BN + PReLU on one channel-major (C, HW_tile) tile."""
    z = jnp.dot(w0a, fsp, preferred_element_type=jnp.float32)
    z = z + jnp.dot(w0b, fcp, preferred_element_type=jnp.float32)
    z = z + bias                                   # (C_out, 1) broadcast
    return jnp.where(z >= 0, z, alpha * z)         # per-channel PReLU


def _attention_plus_one(pooled, w1, w2):
    """conv1 -> ReLU -> conv2 -> sigmoid, returned as (atten + 1)."""
    a1 = jnp.maximum(jnp.dot(w1, pooled, preferred_element_type=jnp.float32), 0.0)
    a2 = jnp.dot(w2, a1, preferred_element_type=jnp.float32)
    # feat * atten + feat == feat * (atten + 1)
    return jax.nn.sigmoid(a2) + 1.0


# ----------------------------------------------------------------------------
# Kernel variant 1: whole image per grid step (used when it fits the budget).
# ----------------------------------------------------------------------------
def _ffm_kernel_single(fsp_ref, fcp_ref, w0a_ref, w0b_ref, bias_ref, alpha_ref,
                       w1_ref, w2_ref, out_ref):
    feat = _conv_bn_prelu(fsp_ref[...], fcp_ref[...],
                          w0a_ref[...], w0b_ref[...],
                          bias_ref[...], alpha_ref[...])          # (C_out, HW)
    pooled = jnp.mean(feat, axis=1, keepdims=True)                # (C_out, 1)
    att_p1 = _attention_plus_one(pooled, w1_ref[...], w2_ref[...])
    out_ref[...] = (feat * att_p1).astype(out_ref.dtype)


# ----------------------------------------------------------------------------
# Kernel variant 2: HW-tiled two-pass kernel, grid = (N, 2, T).
#   p == 0 : accumulate the global-average-pool sum across HW tiles.
#   p == 1 : recompute conv/BN/PReLU per tile and write feat * (atten + 1).
# ----------------------------------------------------------------------------
def _ffm_kernel_tiled(fsp_ref, fcp_ref, w0a_ref, w0b_ref, bias_ref, alpha_ref,
                      w1_ref, w2_ref, out_ref, sum_ref, att_ref, *, inv_hw):
    p = pl.program_id(1)      # 0: pooling pass, 1: output pass
    t = pl.program_id(2)      # HW tile index

    @pl.when(jnp.logical_and(p == 0, t == 0))
    def _():
        sum_ref[...] = jnp.zeros_like(sum_ref)

    @pl.when(p == 0)
    def _():
        feat = _conv_bn_prelu(fsp_ref[...], fcp_ref[...],
                              w0a_ref[...], w0b_ref[...],
                              bias_ref[...], alpha_ref[...])
        sum_ref[...] += jnp.sum(feat, axis=1, keepdims=True)

    @pl.when(jnp.logical_and(p == 1, t == 0))
    def _():
        pooled = sum_ref[...] * inv_hw                            # full-image mean
        att_ref[...] = _attention_plus_one(pooled, w1_ref[...], w2_ref[...])

    @pl.when(p == 1)
    def _():
        feat = _conv_bn_prelu(fsp_ref[...], fcp_ref[...],
                              w0a_ref[...], w0b_ref[...],
                              bias_ref[...], alpha_ref[...])
        out_ref[...] = (feat * att_ref[...]).astype(out_ref.dtype)


# ----------------------------------------------------------------------------
# Wrapper.
# ----------------------------------------------------------------------------
def _pick_hw_tile(hw, c_in, c_out):
    """Largest multiple of 128 dividing hw whose (in+out) f32 tile fits budget."""
    assert hw % 128 == 0, "spatial axis must be a multiple of 128 (lane-dense layout)"
    bytes_per_lane = 4 * (c_in + c_out)
    max_lanes = max(128, (_TILE_BUDGET_BYTES // bytes_per_lane) // 128 * 128)
    if hw <= max_lanes:
        return hw
    for tile in range(max_lanes, 0, -128):
        if hw % tile == 0:
            return tile
    return 128  # unreachable: 128 always divides hw


def feature_fusion_forward(fsp, fcp, params, hw_tile=None):
    """fsp: (N, C_fsp, HW), fcp: (N, C_fcp, HW) float32 (NCHW, H*W flattened).

    Returns (N, C_out, HW) float32.
    """
    w0, gamma, beta, mean, var, alpha, w1, w2 = params
    N, c_fsp, HW = fsp.shape
    _, c_fcp, HW2 = fcp.shape
    assert HW == HW2
    C_out, C_in = w0.shape
    assert C_in == c_fsp + c_fcp

    # Fold inference-mode BatchNorm into the 1x1 conv weight + bias, and split
    # the weight column-wise to match the [fsp, fcp] channel-concat order so
    # no concatenated copy of the input is ever materialized in HBM.
    scale = gamma * jax.lax.rsqrt(var + BN_EPS)                    # (C_out,)
    w0f = w0 * scale[:, None]                                      # (C_out, C_in)
    w0a = w0f[:, :c_fsp]                                           # (C_out, C_fsp)
    w0b = w0f[:, c_fsp:]                                           # (C_out, C_fcp)
    bias = (beta - mean * scale)[:, None]                          # (C_out, 1)
    alpha_c = alpha[:, None]                                       # (C_out, 1)

    if hw_tile is None:
        hw_tile = _pick_hw_tile(HW, C_in, C_out)
    assert hw_tile % 128 == 0 and HW % hw_tile == 0
    n_tiles = HW // hw_tile

    weight_args = (w0a, w0b, bias, alpha_c, w1, w2)
    full2d = lambda a: pl.BlockSpec(a.shape, lambda *idx: (0, 0))  # resident weights
    weight_specs = [full2d(a) for a in weight_args]

    if n_tiles == 1:
        # Whole image per step: single pass, x read once.
        img_in = lambda c: pl.BlockSpec((pl.Squeezed(), c, HW), lambda n: (n, 0, 0))
        grid = (N,)
        semantics = ("parallel",)
        kernel = _ffm_kernel_single
        in_specs = [img_in(c_fsp), img_in(c_fcp)] + weight_specs
        out_spec = pl.BlockSpec((pl.Squeezed(), C_out, HW), lambda n: (n, 0, 0))
        scratch = []
    else:
        # HW-tiled two-pass kernel: x read twice, feat never spilled to HBM.
        tile_in = lambda c: pl.BlockSpec((pl.Squeezed(), c, hw_tile),
                                         lambda n, p, t: (n, 0, t))
        grid = (N, 2, n_tiles)
        semantics = ("parallel", "arbitrary", "arbitrary")
        kernel = functools.partial(_ffm_kernel_tiled, inv_hw=1.0 / HW)
        in_specs = [tile_in(c_fsp), tile_in(c_fcp)] + weight_specs
        # During the pooling pass (p == 0) the output block index is pinned to
        # tile 0, so the unwritten output buffer stays resident and no garbage
        # tile is written back; every output tile is DMA'd to HBM exactly once.
        out_spec = pl.BlockSpec((pl.Squeezed(), C_out, hw_tile),
                                lambda n, p, t: (n, 0, p * t))
        scratch = [pltpu.VMEM((C_out, 1), jnp.float32),   # pooled-sum accumulator
                   pltpu.VMEM((C_out, 1), jnp.float32)]   # (atten + 1)

    return pl.pallas_call(
        kernel,
        out_shape=jax.ShapeDtypeStruct((N, C_out, HW), jnp.float32),
        grid_spec=pltpu.PrefetchScalarGridSpec(
            num_scalar_prefetch=0,
            grid=grid,
            in_specs=in_specs,
            out_specs=out_spec,
            scratch_shapes=scratch,
        ),
        compiler_params=pltpu.CompilerParams(
            dimension_semantics=semantics,
            vmem_limit_bytes=_VMEM_LIMIT_BYTES),
    )(fsp, fcp, *weight_args)


# ----------------------------------------------------------------------------
# Pure-JAX reference with the original (unfolded-BN) module semantics.
# ----------------------------------------------------------------------------
def reference_forward(fsp, fcp, params):
    w0, gamma, beta, mean, var, alpha, w1, w2 = params
    x = jnp.concatenate([fsp, fcp], axis=1)                        # (N, C_in, HW)
    z = jnp.einsum('oc,ncs->nos', w0, x)
    inv_std = jax.lax.rsqrt(var + BN_EPS)
    bn = ((z - mean[None, :, None]) * inv_std[None, :, None]
          * gamma[None, :, None] + beta[None, :, None])
    feat = jnp.where(bn >= 0, bn, alpha[None, :, None] * bn)
    pooled = jnp.mean(feat, axis=2, keepdims=True)                 # (N, C_out, 1)
    a1 = jnp.maximum(jnp.einsum('oc,ncs->nos', w1, pooled), 0.0)
    atten = jax.nn.sigmoid(jnp.einsum('oc,ncs->nos', w2, a1))
    return feat * atten + feat


def make_params(key, in_chan, out_chan):
    """Deterministic synthetic parameters (kaiming-style normals for convs)."""
    ks = jax.random.split(key, 3)
    std0 = (2.0 / (1.0 + 1.0 ** 2) / in_chan) ** 0.5               # kaiming_normal_, a=1
    w0 = std0 * jax.random.normal(ks[0], (out_chan, in_chan), jnp.float32)
    gamma = 1.0 + 0.1 * jnp.arange(out_chan, dtype=jnp.float32)
    beta = 0.05 * jnp.arange(out_chan, dtype=jnp.float32)
    mean = 0.01 * jnp.arange(out_chan, dtype=jnp.float32)
    var = 1.0 + 0.02 * jnp.arange(out_chan, dtype=jnp.float32)
    alpha = jnp.full((out_chan,), 0.25, jnp.float32)                # PReLU default
    std1 = (2.0 / (1.0 + 1.0 ** 2) / out_chan) ** 0.5
    w1 = std1 * jax.random.normal(ks[1], (out_chan // 4, out_chan), jnp.float32)
    std2 = (2.0 / (1.0 + 1.0 ** 2) / (out_chan // 4)) ** 0.5
    w2 = std2 * jax.random.normal(ks[2], (out_chan, out_chan // 4), jnp.float32)
    return (w0, gamma, beta, mean, var, alpha, w1, w2)


if __name__ == "__main__":
    key = jax.random.PRNGKey(0)
    N, H, W = 2, 16, 16
    c_fsp, c_fcp = 4, 4
    in_chan = c_fsp + c_fcp          # channel concat
    out_chan = 8                     # out_chan // 4 == 2

    k1, k2, k3 = jax.random.split(key, 3)
    # PyTorch inputs would be NCHW (2, 4, 16, 16); build the channel-major
    # flattened layout (N, C, H*W) directly so HW lands on the lane axis.
    fsp = jax.random.normal(k1, (N, c_fsp, H * W), jnp.float32)
    fcp = jax.random.normal(k2, (N, c_fcp, H * W), jnp.float32)
    params = make_params(k3, in_chan, out_chan)

    ref = reference_forward(fsp, fcp, params)

    # Path 1: whole image per grid step (default tile selection at this size).
    out = jax.block_until_ready(feature_fusion_forward(fsp, fcp, params))
    assert out.shape == (N, out_chan, H * W)
    assert jnp.allclose(out, ref, atol=1e-4, rtol=1e-4)

    # Path 2: force HW tiling (two-pass pooled-sum accumulation kernel).
    out_t = jax.block_until_ready(
        feature_fusion_forward(fsp, fcp, params, hw_tile=128))
    assert jnp.allclose(out_t, ref, atol=1e-4, rtol=1e-4)

    print("KERNEL_OK")
</pallas_src>

<mosaic_0001>
module attributes {stable_mosaic.version = 11 : i64} {
  func.func @_ffm_kernel_single(%arg0: i32, %arg1: memref<1x4x256xf32, #tpu.memory_space<vmem>>, %arg2: memref<1x4x256xf32, #tpu.memory_space<vmem>>, %arg3: memref<8x4xf32, #tpu.memory_space<vmem>>, %arg4: memref<8x4xf32, #tpu.memory_space<vmem>>, %arg5: memref<8x1xf32, #tpu.memory_space<vmem>>, %arg6: memref<8x1xf32, #tpu.memory_space<vmem>>, %arg7: memref<2x8xf32, #tpu.memory_space<vmem>>, %arg8: memref<8x2xf32, #tpu.memory_space<vmem>>, %arg9: memref<1x8x256xf32, #tpu.memory_space<vmem>>) attributes {dimension_semantics = [#tpu.dimension_semantics<parallel>], iteration_bounds = array<i64: 2>, scalar_prefetch = 0 : i64, scratch_operands = 0 : i64, tpu.core_type = #tpu.core_type<tc>, window_params = [{transform_indices = @transform_0, window_bounds = array<i64: 1, 4, 256>}, {transform_indices = @transform_1, window_bounds = array<i64: 1, 4, 256>}, {pipeline_mode = #tpu.pipeline_mode<synchronous>, transform_indices = @transform_2, window_bounds = array<i64: 8, 4>}, {pipeline_mode = #tpu.pipeline_mode<synchronous>, transform_indices = @transform_3, window_bounds = array<i64: 8, 4>}, {pipeline_mode = #tpu.pipeline_mode<synchronous>, transform_indices = @transform_4, window_bounds = array<i64: 8, 1>}, {pipeline_mode = #tpu.pipeline_mode<synchronous>, transform_indices = @transform_5, window_bounds = array<i64: 8, 1>}, {pipeline_mode = #tpu.pipeline_mode<synchronous>, transform_indices = @transform_6, window_bounds = array<i64: 2, 8>}, {pipeline_mode = #tpu.pipeline_mode<synchronous>, transform_indices = @transform_7, window_bounds = array<i64: 8, 2>}, {transform_indices = @transform_8, window_bounds = array<i64: 1, 8, 256>}]} {
    %c0 = arith.constant 0 : index
    %c0_0 = arith.constant 0 : index
    %c0_1 = arith.constant 0 : index
    %0 = vector.load %arg1[%c0, %c0_0, %c0_1] : memref<1x4x256xf32, #tpu.memory_space<vmem>>, vector<1x4x256xf32>
    %1 = vector.shape_cast %0 : vector<1x4x256xf32> to vector<4x256xf32>
    %c0_2 = arith.constant 0 : index
    %c0_3 = arith.constant 0 : index
    %c0_4 = arith.constant 0 : index
    %2 = vector.load %arg2[%c0_2, %c0_3, %c0_4] : memref<1x4x256xf32, #tpu.memory_space<vmem>>, vector<1x4x256xf32>
    %3 = vector.shape_cast %2 : vector<1x4x256xf32> to vector<4x256xf32>
    %c0_5 = arith.constant 0 : index
    %c0_6 = arith.constant 0 : index
    %4 = vector.load %arg3[%c0_5, %c0_6] : memref<8x4xf32, #tpu.memory_space<vmem>>, vector<8x4xf32>
    %c0_7 = arith.constant 0 : index
    %c0_8 = arith.constant 0 : index
    %5 = vector.load %arg4[%c0_7, %c0_8] : memref<8x4xf32, #tpu.memory_space<vmem>>, vector<8x4xf32>
    %c0_9 = arith.constant 0 : index
    %c0_10 = arith.constant 0 : index
    %6 = vector.load %arg5[%c0_9, %c0_10] : memref<8x1xf32, #tpu.memory_space<vmem>>, vector<8x1xf32>
    %c0_11 = arith.constant 0 : index
    %c0_12 = arith.constant 0 : index
    %7 = vector.load %arg6[%c0_11, %c0_12] : memref<8x1xf32, #tpu.memory_space<vmem>>, vector<8x1xf32>
    %cst = arith.constant dense<0.000000e+00> : vector<8x256xf32>
    %8 = tpu.matmul %4, %1, %cst {dimension_numbers = #tpu.dot_dimension_numbers<[1], [0], [0], [1], [0, 0, 1, 1], [], []>} : vector<8x4xf32>, vector<4x256xf32>, vector<8x256xf32> -> vector<8x256xf32>
    %cst_13 = arith.constant dense<0.000000e+00> : vector<8x256xf32>
    %9 = tpu.matmul %5, %3, %cst_13 {dimension_numbers = #tpu.dot_dimension_numbers<[1], [0], [0], [1], [0, 0, 1, 1], [], []>} : vector<8x4xf32>, vector<4x256xf32>, vector<8x256xf32> -> vector<8x256xf32>
    %10 = arith.addf %8, %9 : vector<8x256xf32>
    %11 = vector.broadcast %6 : vector<8x1xf32> to vector<8x256xf32>
    %12 = arith.addf %10, %11 : vector<8x256xf32>
    %cst_14 = arith.constant 0.000000e+00 : f32
    %13 = vector.broadcast %cst_14 : f32 to vector<8x256xf32>
    %14 = arith.cmpf oge, %12, %13 : vector<8x256xf32>
    %15 = vector.broadcast %7 : vector<8x1xf32> to vector<8x256xf32>
    %16 = arith.mulf %15, %12 : vector<8x256xf32>
    %17 = arith.select %14, %12, %16 : vector<8x256xi1>, vector<8x256xf32>
    %cst_15 = arith.constant dense<0.000000e+00> : vector<8xf32>
    %18 = vector.multi_reduction <add>, %17, %cst_15 [1] : vector<8x256xf32> to vector<8xf32>
    %19 = vector.shape_cast %18 : vector<8xf32> to vector<8x1xf32>
    %cst_16 = arith.constant 2.560000e+02 : f32
    %20 = vector.broadcast %cst_16 : f32 to vector<8x1xf32>
    %21 = arith.divf %19, %20 : vector<8x1xf32>
    %c0_17 = arith.constant 0 : index
    %c0_18 = arith.constant 0 : index
    %22 = vector.load %arg7[%c0_17, %c0_18] : memref<2x8xf32, #tpu.memory_space<vmem>>, vector<2x8xf32>
    %c0_19 = arith.constant 0 : index
    %c0_20 = arith.constant 0 : index
    %23 = vector.load %arg8[%c0_19, %c0_20] : memref<8x2xf32, #tpu.memory_space<vmem>>, vector<8x2xf32>
    %cst_21 = arith.constant dense<0.000000e+00> : vector<2x1xf32>
    %24 = tpu.matmul %22, %21, %cst_21 {dimension_numbers = #tpu.dot_dimension_numbers<[1], [0], [0], [1], [0, 0, 1, 1], [], []>} : vector<2x8xf32>, vector<8x1xf32>, vector<2x1xf32> -> vector<2x1xf32>
    %cst_22 = arith.constant 0.000000e+00 : f32
    %25 = vector.broadcast %cst_22 : f32 to vector<2x1xf32>
    %26 = arith.maximumf %24, %25 : vector<2x1xf32>
    %cst_23 = arith.constant dense<0.000000e+00> : vector<8x1xf32>
    %27 = tpu.matmul %23, %26, %cst_23 {dimension_numbers = #tpu.dot_dimension_numbers<[1], [0], [0], [1], [0, 0, 1, 1], [], []>} : vector<8x2xf32>, vector<2x1xf32>, vector<8x1xf32> -> vector<8x1xf32>
    %28 = arith.negf %27 : vector<8x1xf32>
    %29 = math.exp %28 : vector<8x1xf32>
    %cst_24 = arith.constant 1.000000e+00 : f32
    %30 = vector.broadcast %cst_24 : f32 to vector<8x1xf32>
    %31 = arith.addf %30, %29 : vector<8x1xf32>
    %32 = arith.divf %30, %31 : vector<8x1xf32>
    %cst_25 = arith.constant 1.000000e+00 : f32
    %33 = vector.broadcast %cst_25 : f32 to vector<8x1xf32>
    %34 = arith.addf %32, %33 : vector<8x1xf32>
    %35 = vector.broadcast %34 : vector<8x1xf32> to vector<8x256xf32>
    %36 = arith.mulf %17, %35 : vector<8x256xf32>
    %c0_26 = arith.constant 0 : index
    %c0_27 = arith.constant 0 : index
    %c0_28 = arith.constant 0 : index
    %37 = vector.load %arg9[%c0_26, %c0_27, %c0_28] : memref<1x8x256xf32, #tpu.memory_space<vmem>>, vector<1x8x256xf32>
    %38 = vector.shape_cast %37 : vector<1x8x256xf32> to vector<8x256xf32>
    %39 = vector.shape_cast %36 : vector<8x256xf32> to vector<1x8x256xf32>
    tpu.vector_store %arg9[%c0_26, %c0_27, %c0_28], %39 {strides = array<i32>} : memref<1x8x256xf32, #tpu.memory_space<vmem>>, vector<1x8x256xf32>,
    return
  }
  func.func @transform_0(%arg0: i32) -> (i32, i32, i32) {
    %c0_i32 = arith.constant 0 : i32
    %c0_i32_0 = arith.constant 0 : i32
    %c0_i32_1 = arith.constant 0 : i32
    return %arg0, %c0_i32, %c0_i32_0 : i32, i32, i32
  }
  func.func @transform_1(%arg0: i32) -> (i32, i32, i32) {
    %c0_i32 = arith.constant 0 : i32
    %c0_i32_0 = arith.constant 0 : i32
    %c0_i32_1 = arith.constant 0 : i32
    return %arg0, %c0_i32, %c0_i32_0 : i32, i32, i32
  }
  func.func @transform_2(%arg0: i32) -> (i32, i32) {
    %c0_i32 = arith.constant 0 : i32
    %c0_i32_0 = arith.constant 0 : i32
    %c0_i32_1 = arith.constant 0 : i32
    return %c0_i32, %c0_i32_0 : i32, i32
  }
  func.func @transform_3(%arg0: i32) -> (i32, i32) {
    %c0_i32 = arith.constant 0 : i32
    %c0_i32_0 = arith.constant 0 : i32
    %c0_i32_1 = arith.constant 0 : i32
    return %c0_i32, %c0_i32_0 : i32, i32
  }
  func.func @transform_4(%arg0: i32) -> (i32, i32) {
    %c0_i32 = arith.constant 0 : i32
    %c0_i32_0 = arith.constant 0 : i32
    %c0_i32_1 = arith.constant 0 : i32
    return %c0_i32, %c0_i32_0 : i32, i32
  }
  func.func @transform_5(%arg0: i32) -> (i32, i32) {
    %c0_i32 = arith.constant 0 : i32
    %c0_i32_0 = arith.constant 0 : i32
    %c0_i32_1 = arith.constant 0 : i32
    return %c0_i32, %c0_i32_0 : i32, i32
  }
  func.func @transform_6(%arg0: i32) -> (i32, i32) {
    %c0_i32 = arith.constant 0 : i32
    %c0_i32_0 = arith.constant 0 : i32
    %c0_i32_1 = arith.constant 0 : i32
    return %c0_i32, %c0_i32_0 : i32, i32
  }
  func.func @transform_7(%arg0: i32) -> (i32, i32) {
    %c0_i32 = arith.constant 0 : i32
    %c0_i32_0 = arith.constant 0 : i32
    %c0_i32_1 = arith.constant 0 : i32
    return %c0_i32, %c0_i32_0 : i32, i32
  }
  func.func @transform_8(%arg0: i32) -> (i32, i32, i32) {
    %c0_i32 = arith.constant 0 : i32
    %c0_i32_0 = arith.constant 0 : i32
    %c0_i32_1 = arith.constant 0 : i32
    return %arg0, %c0_i32, %c0_i32_0 : i32, i32, i32
  }
}

</mosaic_0001>

<bundles_post_ra>
// kernel: tpu_custom_call.1
= control target key start
LH: loop header
LB: loop body
LE: loop exit
PB: predicated region body
PF: predicated region fallthrough
CT: control target
= control target key end

     0   :  { %13 = vsyncpa [#allocation3], 0  ;;  %s1099_s0 = inlined_call_operand.vmem [shape: f32[2,4,256], index: 0, kind: input, shape index: {}]   ;;  %s1100_s1 = inlined_call_operand.vmem [shape: f32[2,4,256], index: 1, kind: input, shape index: {}]   ;;  %s1101_s2 = inlined_call_operand.vmem [shape: f32[8,4], index: 2, kind: input, shape index: {}]   ;;  %s1102_s3 = inlined_call_operand.vmem [shape: f32[8,4], index: 3, kind: input, shape index: {}]   ;;  %s1103_s4 = inlined_call_operand.vmem [shape: f32[8,1], index: 4, kind: input, shape index: {}]   ;;  %s1104_s5 = inlined_call_operand.vmem [shape: f32[8,1], index: 5, kind: input, shape index: {}]   ;;  %s1105_s6 = inlined_call_operand.vmem [shape: f32[2,8], index: 6, kind: input, shape index: {}]   ;;  %s1106_s7 = inlined_call_operand.vmem [shape: f32[8,2], index: 7, kind: input, shape index: {}]   ;;  %s1107_s8 = inlined_call_operand.hbm [shape: f32[2,8,256], index: 8, kind: output, shape index: {}]  }
   0x1   :  { %15 = vsyncpa [#allocation3 + $0x1], 0  ;;  %s978_s27 = smov 0   ;;  %s980_s28 = smov 0  }
   0x2   :  { %s982_s29 = smov 0   ;;  %s984_s30 = smov 0  }
   0x3 LB: > { %s999_s9 = sadd.s32 4294967295, %s927_s30   ;;  %s772_s10 = sadd.s32 4294967294, %s927_s30   ;;  %s927_s30 = sphi %s984_s30, %s1113_s30   ;;  %s923_s29 = sphi %s982_s29, %s1112_s29   ;;  %s919_s28 = sphi %s980_s28, %s1111_s28   ;;  %s915_s27 = sphi %s978_s27, %s1110_s27  }
   0x4   : > { %s1003_s11 = sadd.s32 1, %s927_s30   ;;  %s206_s12 = sadd.s32 1, %s923_s29 }
   0x5   : > { %s203_s13 = ssub.s32 %s927_s30, %s1003_s11  ;;  %p216_p0 = scmp.ne.s32.totalorder %s923_s29, %s919_s28 }
   0x6   : > { %p204_p1 = scmp.eq.s32.totalorder %s203_s13, 0  ;;  %p217_p2 = scmp.eq.s32.totalorder %s999_s9, 1 }
   0x7   : > { %p222_p3 = scmp.ne.s32.totalorder %s919_s28, %s915_s27  ;;  %p223_p4 = scmp.eq.s32.totalorder %s772_s10, 1 }
   0x8   : > { %s1014_s14 = scalar_select %p204_p1, %s923_s29, %s206_s12  }
   0x9   : > { %p1016_p5 = por %p217_p2, %p216_p0  ;;  %p1020_p6 = por %p223_p4, %p222_p3 }
   0xa   : > { %p775_p7 = scmp.ge.s32.totalorder %s927_s30, 1  ;;  %p275_p8 = scmp.lt.s32.totalorder %s927_s30, 3 }
   0xc   : > { %p276_p9 = pnand %p775_p7, %p275_p8 }
   0xd   : > { %p314_p10 = scmp.lt.s32.totalorder (!%p276_p9), %s999_s9, 1  ;;  %v929_v0 = vmov (!%p276_p9), 0.0   ;;  %v328_v1 = vld [vmem:[%s1103_s4] sm:$0xff] (!%p276_p9)  ;;  %v930_v2 = vmov (!%p276_p9), 0   ;;  %vm336_vm0 = vcmask (!%p276_p9), 1043456   ;;  %vm332_vm1 = vcmask (!%p276_p9), 31744  }
   0xe   : > { %279 = sbr.rel (%p276_p9) target bundleno = 1003 (0x3eb), region = 52  ;;  %405 = vmatprep.mubr.f32.mxu0 (!%p276_p9), %v929_v0  ;;  %803 = vmatprep.subr.mxu1 (!%p276_p9), %v929_v0  ;;  %v329_v3 = vld [vmem:[%s1104_s5] sm:$0xff] (!%p276_p9)  ;;  %vm931_vm4 = vmmov (!%p276_p9), 0   ;;  %vm517_vm5 = vcmask (!%p276_p9), 64512   ;;  %vm596_vm6 = vcmask (!%p276_p9), 1041408   ;;  %vm592_vm7 = vcmask (!%p276_p9), 15360  }
   0xf   : > { %857 = vset.pattern.permute.xlu0 (!%p276_p9), %v930_v2  ;;  %858 = vset.pattern.permute.xlu1 (!%p276_p9), %v930_v2  ;;  %v327_v8 = vld [vmem:[%s1102_s3] sm:$0xff] (!%p276_p9)  ;;  %s311_s24 = sand.u32 (!%p276_p9), 1, %s919_s28   ;;  %s798_s26 = sshll.u32 (!%p276_p9), %s999_s9, 8 }
  0x10   : > { %494 = vperm.xlu0 (!%p276_p9), %857, %v328_v1   ;;  %v326_v9 = vld [vmem:[%s1101_s2] sm:$0xff] (!%p276_p9)  ;;  %805 = vmatprep.mubr.msk.f32.mxu1 (!%p276_p9), %vm931_vm4, %v929_v0  ;;  %s1057_s18 = scalar_lea.hbm (!%p276_p9), %s1107_s8, %s798_s26 }
  0x11   : > { %v515_v23 = vld [vmem:[%s1105_s6] sm:$0x3] (!%p276_p9) }
  0x12   : > { %v516_v27 = vld [vmem:[%s1106_s7] sm:$0xff] (!%p276_p9) }
  0x14   : > { %503 = vperm.xlu0 (!%p276_p9), %857, %v329_v3  }
  0x15   : > { %s315_s19 = scalar_select %p314_p10, %s999_s9, 1 }
  0x16   : > { %s932_s9 = smov [#allocation2]  }
  0x17   : > { %s796_s20 = sshll.u32 %s315_s19, 3  ;;  %s687_s19 = scalar_lea.sflag [#allocation3], %s311_s24 }
  0x18   : > { %s318_s25 = scalar_lea.vmem %s1099_s0, %s796_s20  ;;  %s323_s12 = scalar_lea.vmem %s1100_s1, %s796_s20 }
  0x19   : > { %v324_v4 = vld [vmem:[%s318_s25] sm:$0xff]  ;;  %s776_s25 = sshll.u32 %s311_s24, 4  ;;  %s869_s21 = sshll.u32 %s932_s9, 4  ;;  %s870_s21 = int_to_ptr.vmem [resolvable:$false] %s869_s21 }
  0x1a   : > { %v325_v5 = vld [vmem:[%s323_s12] sm:$0xff]  ;;  %v413_v7 = vcombine.high %v324_v4, %v324_v4  ;;  %s313_s10 = scalar_lea.vmem [#allocation2], %s776_s25  ;;  %s871_s22 = scalar_lea.vmem %s870_s21, 512 }
  0x1b   : > { %v331_v6 = vcombine.high %v325_v5, %v325_v5  ;;  %s701_s12 = sshll.u32 %s313_s10, 4  ;;  %s1059_s12 = int_to_ptr.vmem [resolvable:$true] %s701_s12 }
  0x1c   : > { %s865_s20 = scalar_lea.vmem %s1059_s12, 256  ;;  %p872_p0 = scmp.lt.s32.totalorder %s1059_s12, %s870_s21 }
  0x1d   : > { %781 = vmatprep.subr.msk.mxu0 %vm336_vm0, %v331_v6  ;;  %p866_p11 = scmp.ne.s32.totalorder %s1059_s12, %s865_s20  ;;  %p873_p1 = scmp.lt.s32.totalorder %s871_s22, %s865_s20 }
  0x1e   : > { %782 = vmatpush1.msk.msra.mxu0 %vm336_vm0, %v325_v5 }
  0x1f   : > { %783 = vmatmul.mubr.msk.f32.vlgmr.msra.gmra.mrb[0].mxu0 %vm332_vm1, %v327_v8  ;;  %784 = vmatprep.subr.msk.mxu0 %vm336_vm0, %v413_v7  ;;  %p867_p12 = pnand %p866_p11, %p1016_p5  ;;  %p874_p2 = por %p873_p1, %p872_p0 }
  0x20   : > { %785 = vmatpush1.msk.msra.mxu0 %vm336_vm0, %v324_v4  ;;  %485 = vmatprep.mubr.f32.mxu0 %v929_v0 }
  0x21   : > { %p868_p13 = pneg %p867_p12 }
  0x23   : > { %p875_p3 = pnand %p874_p2, %p868_p13 }
  0x27   : > { %786 = vmatmul.mubr.msk.f32.vlgmr.msra.gmra.mrb[0].mxu0 %vm332_vm1, %v326_v9 }
  0x8f   : > { %v495_v10 = vpop.permute.xlu0 %494 }
  0x93   : > { %v504_v14 = vpop.permute.xlu0 %503 }
  0xfa   : > { %v487_v11 = vpop.f32.mrb[0].mxu0 }
  0xfb   : > { %v497_v12 = vadd.f32 %v495_v10, %v487_v11  ;;  %v489_v13 = vpop.f32.mrb[1].mxu0 }
  0xfc   : > { %v498_v15 = vadd.f32 %v495_v10, %v489_v13 }
  0xfd   : > { %v506_v16 = vmul.f32 %v504_v14, %v497_v12  ;;  %vm499_vm2 = vcmp.ge.f32.partialorder %v497_v12, 0.0 }
  0xfe   : > { %v507_v17 = vmul.f32 %v504_v14, %v498_v15  ;;  %vm500_vm3 = vcmp.ge.f32.partialorder %v498_v15, 0.0 }
  0xff   : > { %v508_v18 = vsel %vm499_vm2, %v497_v12, %v506_v16 }
 0x100   : > { %v509_v19 = vsel %vm500_vm3, %v498_v15, %v507_v17 }
 0x101   : > { %v510_v20 = vadd.f32 %v509_v19, %v508_v18 }
 0x103   : > { %511 = vadd.xlane.f32.xlu1 %v510_v20 }
 0x190   : > { %v512_v21 = vpop.xlane.xlu1 %511 }
 0x191   : > { %v514_v22 = vmul.f32 0.00390625, %v512_v21 }
 0x193   : > { %804 = vmatpush3.msra.mxu1 %v514_v22 }
 0x194   : > { %806 = vmatmul.mubr.msk.f32.vlgmr.msra.gmra.mrb[0].mxu1 %vm517_vm5, %v515_v23  ;;  %808 = vmatprep.subr.mxu1 %v929_v0 }
 0x195   : > { %810 = vmatprep.mubr.msk.f32.mxu1 %vm931_vm4, %v929_v0 }
 0x267   : > { %v587_v24 = vpop.f32.mrb[0].mxu1 }
 0x268   : > { %v591_v25 = vmax.f32 %v587_v24, 0.0  ;;  %v807_v26 = vpop.f32.mrb[1].mxu1 }
 0x26a   : > { %809 = vmatpush3.msk.msra.mxu1 %vm596_vm6, %v591_v25 }
 0x26b   : > { %811 = vmatmul.mubr.msk.f32.vlgmr.msra.gmra.mrb[2].mxu1 %vm592_vm7, %v516_v27 }
 0x33e   : > { %v666_v28 = vpop.f32.mrb[2].mxu1 }
 0x33f   : > { %v790_v29 = vmul.f32 -1.442695, %v666_v28  ;;  %v812_v30 = vpop.f32.mrb[3].mxu1 }
 0x341   : > { %861 = vpow2.f32 %v790_v29 }
 0x34b   : > { %v862_v31 = vpop.eup %861 }
 0x34c   : > { %v673_v32 = vadd.f32 1.0, %v862_v31 }
 0x34e   : > { %863 = vrcp.f32 %v673_v32 }
 0x358   : > { %v864_v33 = vpop.eup %863 }
 0x359   : > { %v676_v34 = vadd.f32 1.0, %v864_v33 }
 0x35b   : > { %679 = vperm.xlu1 %858, %v676_v34  }
 0x3da   : > { %v680_v35 = vpop.permute.xlu1 %679 }
 0x3db   : > { %v682_v36 = vmul.f32 %v680_v35, %v508_v18  ;;  %v683_v37 = vmul.f32 %v680_v35, %v509_v19 }
 0x3dd   : > { %684 = vst [vmem:[%s313_s10] sm:$0xff] %v682_v36  ;;  %685 = vst [vmem:[%s313_s10 + $0x8] sm:$0xff] %v683_v37 }
 0x3de   : > { %878 = shalt.err (!%p875_p3)
}
 0x3df   : > { %s879_s23 = scalar_lea.hbm %s1057_s18, 256  ;;  %s883_s26 = scalar_lea.hbm %s1107_s8, 512 }
 0x3e0   : > { %p880_p4 = scmp.ne.s32.totalorder %s1057_s18, %s879_s23  ;;  %p884_p9 = scmp.lt.u32.totalorder %s1057_s18, %s1107_s8 }
 0x3e1   : > { %p885_p10 = scmp.lt.u32.totalorder %s883_s26, %s879_s23  ;;  %p887_p12 = scmp.lt.u32.totalorder %s879_s23, %s1057_s18 }
 0x3e2   : > { %p881_p7 = pnand %p880_p4, %p1016_p5 }
 0x3e3   : > { %p886_p11 = por %p885_p10, %p884_p9 }
 0x3e4   : > { %p882_p8 = pneg %p881_p7 }
 0x3e5   : > { %p888_p13 = por %p887_p12, %p886_p11 }
 0x3e7   : > { %p889_p0 = pnand %p888_p13, %p882_p8 }
 0x3e9   : > { %892 = shalt.err (!%p889_p0)
}
 0x3ea   : > { %815 = dma.vmem_to_hbm [thread:$0]  (%p1016_p5), %s1059_s12, 256, %s1057_s18, %s687_s19  }
 0x3eb PF: > { %p821_p1 = scmp.ge.s32.totalorder %s927_s30, 2  ;;  %s713_s17 = sand.u32 1, %s915_s27  }
 0x3ec   : > { %s714_s20 = scalar_lea.sflag [#allocation3], %s713_s17 }
 0x3ed   : > { %p818_p2 = pnand %p821_p1, %p1020_p6 }
 0x3ef   : > { %910 = dma.done.wait (!%p818_p2), %s714_s20, 256  }
 0x3f0   : > { %912 = vsyncadd (!%p818_p2), %s714_s20, 4294967040  ;;  %p18_p3 = scmp.ge.s32.totalorder %s1003_s11, 4   ;;  %s1110_s27 = smov %s919_s28 }
 0x3f1   : > { %s1111_s28 = smov %s923_s29  ;;  %s1112_s29 = smov %s1014_s14 }
 0x3f2   : > { %s1113_s30 = smov %s1003_s11  ;;  %20 = sbr.rel (!%p18_p3) target bundleno = 3 (0x3), region = 90 }
 0x3f9   :  { %719 = vsyncpa [#allocation3], 1 }
 0x3fa   :  { %721 = vsyncpa [#allocation3 + $0x1], 1 }

</bundles_post_ra>
